<compile_context>
chip_gen: v6e
topology: v6e:2x2x1
jax: 0.10.0
libtpu: 0.0.40
codegen_flags: <defaults>
</compile_context>

<pallas_src>
import numpy as np
import jax
import jax.numpy as jnp
from jax.experimental import pallas as pl
from jax.experimental.pallas import tpu as pltpu

_BIG = 1e30  # score mask value; never wins the argmin


def _round_up(v, m):
    return ((v + m - 1) // m) * m


def _smote_kernel(nc_ref, interp_ref, b2_ref, chosen_ref, benign_ref, out_ref,
                  min_sc, nbr_sc):
    """One (TM chosen rows) x (TN benign cols) tile of the SMOTE hot path.

    nc_ref     : (1,)      int32   SMEM  number of valid benign columns
    interp_ref : (1,)      float32 SMEM  interpolation coefficient in [0,1)
    b2_ref     : (1, TN)   float32 VMEM  ||b_j||^2 for this benign column tile
    chosen_ref : (TM, Dp)  float32 VMEM  tile of chosen (minority) embeddings
    benign_ref : (TN, Dp)  float32 VMEM  tile of sampled benign embeddings
    out_ref    : (TM, Dp)  float32 VMEM  synthetic (interpolated) embeddings
    min_sc     : (TM, 1)   float32 VMEM  running per-row min score
    nbr_sc     : (TM, Dp)  float32 VMEM  running best-neighbour embedding
    """
    i = pl.program_id(0)          # chosen-row tile
    j = pl.program_id(1)          # benign-col tile (reduction axis)

    @pl.when(j == 0)
    def _():
        min_sc[...] = jnp.full_like(min_sc, jnp.inf)
        nbr_sc[...] = jnp.zeros_like(nbr_sc)

    c = chosen_ref[...]                       # (TM, Dp) f32
    b = benign_ref[...]                       # (TN, Dp) f32
    tm = c.shape[0]
    tn = b.shape[0]

    # Nearest-neighbour score: argmin_j ||c_i - b_j|| == argmin_j (||b_j||^2 - 2<c_i,b_j>)
    # (per-row ||c_i||^2 and the sqrt are monotone / constant, so dropped).
    dn = (((1,), (1,)), ((), ()))             # contract the feature dim of both
    cb = jax.lax.dot_general(c.astype(jnp.bfloat16), b.astype(jnp.bfloat16), dn,
                             preferred_element_type=jnp.float32)         # (TM, TN)
    score = b2_ref[...] - 2.0 * cb                                        # (TM, TN)

    local_col = jax.lax.broadcasted_iota(jnp.int32, (tm, tn), 1)
    row = jax.lax.broadcasted_iota(jnp.int32, (tm, tn), 0) + i * tm       # global chosen row
    col = local_col + j * tn                                              # global benign col
    n_valid = nc_ref[0]
    # diagonal mask (reference: np.fill_diagonal(dist, dist.max()+100)) and mask
    # of the padded benign columns -- neither can ever win the argmin.
    score = jnp.where((row == col) | (col >= n_valid), _BIG, score)

    # first-occurrence local argmin along this benign tile: min + masked index-min.
    smin = jnp.min(score, axis=-1, keepdims=True)                         # (TM, 1)
    lidx = jnp.min(jnp.where(score == smin, local_col, tn),
                   axis=-1, keepdims=True)                                # (TM, 1) int32

    # Gather b[lidx] within the tile as a one-hot MXU matmul (exact in f32).
    onehot = (local_col == lidx).astype(jnp.float32)                      # (TM, TN)
    local_nbr = jnp.dot(onehot, b, preferred_element_type=jnp.float32)    # (TM, Dp)

    # online argmin across benign tiles: strict < keeps first occurrence on ties.
    better = smin < min_sc[...]                                           # (TM, 1)
    min_sc[...] = jnp.where(better, smin, min_sc[...])
    nbr_sc[...] = jnp.where(better, local_nbr, nbr_sc[...])

    @pl.when(j == pl.num_programs(1) - 1)
    def _():
        t = interp_ref[0]
        # out = c + (b[nbr] - c) * t
        out_ref[...] = c * (1.0 - t) + nbr_sc[...] * t


def _smote_pallas(interp, chosen_embed, benign_embed):
    """Pallas hot path: masked nearest-neighbour argmin + SMOTE interpolation."""
    nc, d = chosen_embed.shape
    dp = _round_up(d, 128)                                # lane-dense last dim
    if nc >= 256:
        t_blk = 256                                       # fills a 256x256 MXU pass
    elif nc >= 128:
        t_blk = 128
    else:
        t_blk = _round_up(max(nc, 1), 8)                  # single tile, 8-aligned
    tm = tn = t_blk
    ncp = _round_up(nc, t_blk)                            # multiple of the tile

    c_pad = jnp.zeros((ncp, dp), jnp.float32).at[:nc, :d].set(
        chosen_embed.astype(jnp.float32))
    b_pad = jnp.zeros((ncp, dp), jnp.float32).at[:nc, :d].set(
        benign_embed.astype(jnp.float32))
    # ||b_j||^2 as a lane-dense row vector (padded columns are masked in-kernel).
    b2 = jnp.sum(b_pad * b_pad, axis=-1)[None, :]                          # (1, NCp)

    nc_arr = jnp.asarray([nc], jnp.int32)
    interp_arr = jnp.asarray(interp, jnp.float32).reshape(1)

    grid = (ncp // tm, ncp // tn)
    est_vmem = (2 * tn * dp * 4           # benign tile (double-buffered)
                + 2 * tm * dp * 4         # chosen tile
                + 2 * tm * dp * 4         # out tile
                + 2 * 8 * tn * 4          # ||b||^2 tile (sublane-padded)
                + tm * dp * 4 + tm * 32   # scratch accumulators
                + 8 * tm * tn * 4         # score / iota / one-hot intermediates
                + (2 << 20))              # headroom
    vmem_limit = int(min(64 * 2**20, max(est_vmem, 16 * 2**20)))  # fits v7x's 64 MiB

    out = pl.pallas_call(
        _smote_kernel,
        out_shape=jax.ShapeDtypeStruct((ncp, dp), jnp.float32),
        grid_spec=pltpu.PrefetchScalarGridSpec(
            num_scalar_prefetch=0,
            grid=grid,
            in_specs=[
                pl.BlockSpec(memory_space=pltpu.MemorySpace.SMEM),   # nc (valid cols)
                pl.BlockSpec(memory_space=pltpu.MemorySpace.SMEM),   # interp scalar
                pl.BlockSpec((1, tn), lambda i, j: (0, j)),          # ||b||^2 tile
                pl.BlockSpec((tm, dp), lambda i, j: (i, 0)),         # chosen tile
                pl.BlockSpec((tn, dp), lambda i, j: (j, 0)),         # benign tile
            ],
            out_specs=pl.BlockSpec((tm, dp), lambda i, j: (i, 0)),
            scratch_shapes=[
                pltpu.VMEM((tm, 1), jnp.float32),    # running min score
                pltpu.VMEM((tm, dp), jnp.float32),   # running best neighbour
            ],
        ),
        compiler_params=pltpu.CompilerParams(
            dimension_semantics=("parallel", "arbitrary"),  # reduction axis last
            vmem_limit_bytes=vmem_limit,
        ),
    )(nc_arr, interp_arr, b2, c_pad, b_pad)
    return out[:nc, :d]


def _prepare(x, y, idx_train, key):
    """Host-side glue: data-dependent-shape index selection + RNG draws."""
    y_np = np.asarray(y)
    idx_np = np.asarray(idx_train)
    idx_benign_train = idx_np[(y_np == 0)[idx_np]]   # training nodes with label 0
    chosen = idx_np[(y_np == 1)[idx_np]]             # minority training nodes (label 1)
    nc = int(chosen.shape[0])
    nb = int(idx_benign_train.shape[0])

    k_sample, k_interp = jax.random.split(key)
    sampled_pos = jax.random.randint(k_sample, (nc,), 0, max(nb, 1))
    interp = jax.random.uniform(k_interp, (), dtype=jnp.float32)

    benign_idx = jnp.asarray(idx_benign_train, jnp.int32)[sampled_pos]
    chosen_embed = x[jnp.asarray(chosen, jnp.int32)]
    benign_embed = x[benign_idx]
    # TODO(synk): fold the two x-row gathers into the kernel (scalar-prefetched
    # indices + pl.Element row gather) to remove the extra HBM round trip.
    return chosen, chosen_embed, benign_embed, interp


def graph_smote_forward(x, y, idx_train, key):
    """Equivalent of GraphSmote.forward(x, y, idx_train) (adj=None branch)."""
    chosen, chosen_embed, benign_embed, interp = _prepare(x, y, idx_train, key)
    nc = int(chosen.shape[0])
    if nc == 0:
        return x, y, idx_train

    new_embed = _smote_pallas(interp, chosen_embed, benign_embed)

    new_labels = jnp.full((nc,), 1, dtype=y.dtype)
    idx_new = jnp.arange(x.shape[0], x.shape[0] + nc, dtype=idx_train.dtype)

    x_out = jnp.concatenate([x, new_embed.astype(x.dtype)], axis=0)
    y_out = jnp.concatenate([y, new_labels], axis=0)
    idx_out = jnp.concatenate([idx_train, idx_new], axis=0)
    return x_out, y_out, idx_out


def _reference_new_embed(chosen_embed, benign_embed, interp):
    """Pure-JAX reference mirroring the kernel's scoring precision (bf16 MXU feed)."""
    c = chosen_embed.astype(jnp.float32)
    b = benign_embed.astype(jnp.float32)
    dn = (((1,), (1,)), ((), ()))
    cb = jax.lax.dot_general(c.astype(jnp.bfloat16), b.astype(jnp.bfloat16), dn,
                             preferred_element_type=jnp.float32)
    score = jnp.sum(b * b, axis=-1)[None, :] - 2.0 * cb
    nc = c.shape[0]
    score = jnp.where(jnp.eye(nc, dtype=bool), _BIG, score)
    nbr = jnp.argmin(score, axis=-1)
    return c + (b[nbr] - c) * interp


if __name__ == "__main__":
    key = jax.random.PRNGKey(0)
    k_x, k_fwd = jax.random.split(key)

    N, D = 32, 32          # nodes, embedding dim
    x = jax.random.normal(k_x, (N, D), dtype=jnp.float32)

    # deterministic labels: last 8 nodes are the minority class (label 1)
    y = jnp.concatenate([jnp.zeros((24,), jnp.int32), jnp.ones((8,), jnp.int32)])

    # training set: 12 benign nodes + 4 minority nodes
    idx_train = jnp.array(list(range(12)) + [24, 25, 26, 27], dtype=jnp.int32)

    x_new, y_new, idx_new = graph_smote_forward(x, y, idx_train, k_fwd)
    jax.block_until_ready((x_new, y_new, idx_new))

    nc = 4  # minority training nodes
    assert x_new.shape == (N + nc, D)
    assert y_new.shape == (N + nc,)
    assert idx_new.shape == (idx_train.shape[0] + nc,)
    assert bool(jnp.all(jnp.isfinite(x_new)))
    assert bool(jnp.all(y_new[N:] == 1))
    assert bool(jnp.all(idx_new[-nc:] == jnp.arange(N, N + nc)))

    # correctness of the Pallas hot path vs. a pure-JAX reference
    _, chosen_embed, benign_embed, interp = _prepare(x, y, idx_train, k_fwd)
    ref = _reference_new_embed(chosen_embed, benign_embed, interp)
    assert bool(jnp.allclose(x_new[N:], ref, rtol=1e-5, atol=1e-5))

    print("KERNEL_OK")
</pallas_src>

<mosaic_0001>
module attributes {stable_mosaic.version = 11 : i64} {
  func.func @_smote_kernel(%arg0: i32, %arg1: i32, %arg2: memref<1xi32, #tpu.memory_space<smem>>, %arg3: memref<1xf32, #tpu.memory_space<smem>>, %arg4: memref<1x8xf32, #tpu.memory_space<vmem>>, %arg5: memref<8x128xf32, #tpu.memory_space<vmem>>, %arg6: memref<8x128xf32, #tpu.memory_space<vmem>>, %arg7: memref<8x128xf32, #tpu.memory_space<vmem>>, %arg8: memref<8x1xf32, #tpu.memory_space<vmem>>, %arg9: memref<8x128xf32, #tpu.memory_space<vmem>>) attributes {dimension_semantics = [#tpu.dimension_semantics<parallel>, #tpu.dimension_semantics<arbitrary>], iteration_bounds = array<i64: 1, 1>, scalar_prefetch = 0 : i64, scratch_operands = 2 : i64, tpu.core_type = #tpu.core_type<tc>, window_params = [{transform_indices = @transform_0, window_bounds = array<i64: 1>}, {transform_indices = @transform_1, window_bounds = array<i64: 1>}, {transform_indices = @transform_2, window_bounds = array<i64: 1, 8>}, {transform_indices = @transform_3, window_bounds = array<i64: 8, 128>}, {transform_indices = @transform_4, window_bounds = array<i64: 8, 128>}, {transform_indices = @transform_5, window_bounds = array<i64: 8, 128>}]} {
    %c0_i32 = arith.constant 0 : i32
    %0 = arith.cmpi eq, %arg1, %c0_i32 : i32
    %1 = arith.extui %0 : i1 to i32
    %c0_i32_0 = arith.constant 0 : i32
    %2 = arith.cmpi ne, %1, %c0_i32_0 : i32
    scf.if %2 {
      %cst_26 = arith.constant 0x7F800000 : f32
      %54 = vector.broadcast %cst_26 : f32 to vector<8x1xf32>
      %c0_27 = arith.constant 0 : index
      %c0_28 = arith.constant 0 : index
      %55 = vector.load %arg8[%c0_27, %c0_28] : memref<8x1xf32, #tpu.memory_space<vmem>>, vector<8x1xf32>
      tpu.vector_store %arg8[%c0_27, %c0_28], %54 {strides = array<i32>} : memref<8x1xf32, #tpu.memory_space<vmem>>, vector<8x1xf32>,
      %cst_29 = arith.constant 0.000000e+00 : f32
      %56 = vector.broadcast %cst_29 : f32 to vector<8x128xf32>
      %c0_30 = arith.constant 0 : index
      %c0_31 = arith.constant 0 : index
      %57 = vector.load %arg9[%c0_30, %c0_31] : memref<8x128xf32, #tpu.memory_space<vmem>>, vector<8x128xf32>
      tpu.vector_store %arg9[%c0_30, %c0_31], %56 {strides = array<i32>} : memref<8x128xf32, #tpu.memory_space<vmem>>, vector<8x128xf32>,
    } else {
    }
    %c0 = arith.constant 0 : index
    %c0_1 = arith.constant 0 : index
    %3 = vector.load %arg5[%c0, %c0_1] : memref<8x128xf32, #tpu.memory_space<vmem>>, vector<8x128xf32>
    %c0_2 = arith.constant 0 : index
    %c0_3 = arith.constant 0 : index
    %4 = vector.load %arg6[%c0_2, %c0_3] : memref<8x128xf32, #tpu.memory_space<vmem>>, vector<8x128xf32>
    %5 = arith.truncf %3 : vector<8x128xf32> to vector<8x128xbf16>
    %6 = arith.truncf %4 : vector<8x128xf32> to vector<8x128xbf16>
    %cst = arith.constant dense<0.000000e+00> : vector<8x8xf32>
    %7 = tpu.matmul %5, %6, %cst {dimension_numbers = #tpu.dot_dimension_numbers<[1], [1], [0], [0], [0, 0, 1, 0], [], []>} : vector<8x128xbf16>, vector<8x128xbf16>, vector<8x8xf32> -> vector<8x8xf32>
    %c0_4 = arith.constant 0 : index
    %c0_5 = arith.constant 0 : index
    %8 = vector.load %arg4[%c0_4, %c0_5] : memref<1x8xf32, #tpu.memory_space<vmem>>, vector<1x8xf32>
    %cst_6 = arith.constant 2.000000e+00 : f32
    %9 = vector.broadcast %cst_6 : f32 to vector<8x8xf32>
    %10 = arith.mulf %9, %7 : vector<8x8xf32>
    %11 = vector.broadcast %8 : vector<1x8xf32> to vector<8x8xf32>
    %12 = arith.subf %11, %10 : vector<8x8xf32>
    %13 = tpu.iota {dimensions = array<i32: 1>} : vector<8x8xi32>
    %14 = tpu.iota {dimensions = array<i32: 0>} : vector<8x8xi32>
    %c8_i32 = arith.constant 8 : i32
    %15 = arith.muli %arg0, %c8_i32 : i32
    %16 = vector.broadcast %15 : i32 to vector<8x8xi32>
    %17 = arith.addi %14, %16 : vector<8x8xi32>
    %c8_i32_7 = arith.constant 8 : i32
    %18 = arith.muli %arg1, %c8_i32_7 : i32
    %19 = vector.broadcast %18 : i32 to vector<8x8xi32>
    %20 = arith.addi %13, %19 : vector<8x8xi32>
    %c0_8 = arith.constant 0 : index
    %21 = memref.load %arg2[%c0_8] : memref<1xi32, #tpu.memory_space<smem>>
    %22 = arith.cmpi eq, %17, %20 : vector<8x8xi32>
    %23 = vector.broadcast %21 : i32 to vector<8x8xi32>
    %24 = arith.cmpi sge, %20, %23 : vector<8x8xi32>
    %25 = arith.ori %22, %24 : vector<8x8xi1>
    %cst_9 = arith.constant 1.000000e+30 : f32
    %26 = vector.broadcast %cst_9 : f32 to vector<8x8xf32>
    %27 = arith.select %25, %26, %12 : vector<8x8xi1>, vector<8x8xf32>
    %cst_10 = arith.constant dense<0x7F800000> : vector<8xf32>
    %28 = vector.multi_reduction <minimumf>, %27, %cst_10 [1] : vector<8x8xf32> to vector<8xf32>
    %29 = vector.shape_cast %28 : vector<8xf32> to vector<8x1xf32>
    %30 = vector.broadcast %29 : vector<8x1xf32> to vector<8x8xf32>
    %31 = arith.cmpf oeq, %27, %30 : vector<8x8xf32>
    %c8_i32_11 = arith.constant 8 : i32
    %32 = vector.broadcast %c8_i32_11 : i32 to vector<8x8xi32>
    %33 = arith.select %31, %13, %32 : vector<8x8xi1>, vector<8x8xi32>
    %cst_12 = arith.constant dense<2147483647> : vector<8xi32>
    %34 = vector.multi_reduction <minsi>, %33, %cst_12 [1] : vector<8x8xi32> to vector<8xi32>
    %35 = vector.shape_cast %34 : vector<8xi32> to vector<8x1xi32>
    %36 = vector.broadcast %35 : vector<8x1xi32> to vector<8x8xi32>
    %37 = arith.cmpi eq, %13, %36 : vector<8x8xi32>
    %38 = arith.extui %37 : vector<8x8xi1> to vector<8x8xi32>
    %39 = arith.sitofp %38 : vector<8x8xi32> to vector<8x8xf32>
    %cst_13 = arith.constant dense<0.000000e+00> : vector<8x128xf32>
    %40 = tpu.matmul %39, %4, %cst_13 {dimension_numbers = #tpu.dot_dimension_numbers<[1], [0], [0], [1], [0, 0, 1, 1], [], []>} : vector<8x8xf32>, vector<8x128xf32>, vector<8x128xf32> -> vector<8x128xf32>
    %c0_14 = arith.constant 0 : index
    %c0_15 = arith.constant 0 : index
    %41 = vector.load %arg8[%c0_14, %c0_15] : memref<8x1xf32, #tpu.memory_space<vmem>>, vector<8x1xf32>
    %42 = arith.cmpf olt, %29, %41 : vector<8x1xf32>
    %c0_16 = arith.constant 0 : index
    %c0_17 = arith.constant 0 : index
    %43 = vector.load %arg8[%c0_16, %c0_17] : memref<8x1xf32, #tpu.memory_space<vmem>>, vector<8x1xf32>
    %44 = arith.select %42, %29, %43 : vector<8x1xi1>, vector<8x1xf32>
    %c0_18 = arith.constant 0 : index
    %c0_19 = arith.constant 0 : index
    %45 = vector.load %arg8[%c0_18, %c0_19] : memref<8x1xf32, #tpu.memory_space<vmem>>, vector<8x1xf32>
    tpu.vector_store %arg8[%c0_18, %c0_19], %44 {strides = array<i32>} : memref<8x1xf32, #tpu.memory_space<vmem>>, vector<8x1xf32>,
    %c0_20 = arith.constant 0 : index
    %c0_21 = arith.constant 0 : index
    %46 = vector.load %arg9[%c0_20, %c0_21] : memref<8x128xf32, #tpu.memory_space<vmem>>, vector<8x128xf32>
    %47 = vector.shape_cast %42 : vector<8x1xi1> to vector<8x1xi1>
    %48 = vector.broadcast %47 : vector<8x1xi1> to vector<8x128xi1>
    %49 = arith.select %48, %40, %46 : vector<8x128xi1>, vector<8x128xf32>
    %c0_22 = arith.constant 0 : index
    %c0_23 = arith.constant 0 : index
    %50 = vector.load %arg9[%c0_22, %c0_23] : memref<8x128xf32, #tpu.memory_space<vmem>>, vector<8x128xf32>
    tpu.vector_store %arg9[%c0_22, %c0_23], %49 {strides = array<i32>} : memref<8x128xf32, #tpu.memory_space<vmem>>, vector<8x128xf32>,
    %c0_i32_24 = arith.constant 0 : i32
    %51 = arith.cmpi eq, %arg1, %c0_i32_24 : i32
    %52 = arith.extui %51 : i1 to i32
    %c0_i32_25 = arith.constant 0 : i32
    %53 = arith.cmpi ne, %52, %c0_i32_25 : i32
    scf.if %53 {
      %c0_26 = arith.constant 0 : index
      %54 = memref.load %arg3[%c0_26] : memref<1xf32, #tpu.memory_space<smem>>
      %cst_27 = arith.constant 1.000000e+00 : f32
      %55 = arith.subf %cst_27, %54 : f32
      %56 = vector.broadcast %55 : f32 to vector<8x128xf32>
      %57 = arith.mulf %3, %56 : vector<8x128xf32>
      %c0_28 = arith.constant 0 : index
      %c0_29 = arith.constant 0 : index
      %58 = vector.load %arg9[%c0_28, %c0_29] : memref<8x128xf32, #tpu.memory_space<vmem>>, vector<8x128xf32>
      %59 = vector.broadcast %54 : f32 to vector<8x128xf32>
      %60 = arith.mulf %58, %59 : vector<8x128xf32>
      %61 = arith.addf %57, %60 : vector<8x128xf32>
      %c0_30 = arith.constant 0 : index
      %c0_31 = arith.constant 0 : index
      %62 = vector.load %arg7[%c0_30, %c0_31] : memref<8x128xf32, #tpu.memory_space<vmem>>, vector<8x128xf32>
      tpu.vector_store %arg7[%c0_30, %c0_31], %61 {strides = array<i32>} : memref<8x128xf32, #tpu.memory_space<vmem>>, vector<8x128xf32>,
    } else {
    }
    return
  }
  func.func @transform_0(%arg0: i32, %arg1: i32) -> i32 {
    %c0_i32 = arith.constant 0 : i32
    %c0_i32_0 = arith.constant 0 : i32
    return %c0_i32 : i32
  }
  func.func @transform_1(%arg0: i32, %arg1: i32) -> i32 {
    %c0_i32 = arith.constant 0 : i32
    %c0_i32_0 = arith.constant 0 : i32
    return %c0_i32 : i32
  }
  func.func @transform_2(%arg0: i32, %arg1: i32) -> (i32, i32) {
    %c0_i32 = arith.constant 0 : i32
    %c0_i32_0 = arith.constant 0 : i32
    return %c0_i32, %arg1 : i32, i32
  }
  func.func @transform_3(%arg0: i32, %arg1: i32) -> (i32, i32) {
    %c0_i32 = arith.constant 0 : i32
    %c0_i32_0 = arith.constant 0 : i32
    return %arg0, %c0_i32 : i32, i32
  }
  func.func @transform_4(%arg0: i32, %arg1: i32) -> (i32, i32) {
    %c0_i32 = arith.constant 0 : i32
    %c0_i32_0 = arith.constant 0 : i32
    return %arg1, %c0_i32 : i32, i32
  }
  func.func @transform_5(%arg0: i32, %arg1: i32) -> (i32, i32) {
    %c0_i32 = arith.constant 0 : i32
    %c0_i32_0 = arith.constant 0 : i32
    return %arg0, %c0_i32 : i32, i32
  }
}

</mosaic_0001>

<bundles_post_ra>
// kernel: tpu_custom_call.1
= control target key start
LH: loop header
LB: loop body
LE: loop exit
PB: predicated region body
PF: predicated region fallthrough
CT: control target
= control target key end

     0   :  { %12 = vsyncpa [#allocation7], 0  ;;  %s418_s0 = inlined_call_operand.<no memory space> [shape: s32[1], index: 0, kind: input, shape index: {}]   ;;  %s419_s1 = inlined_call_operand.<no memory space> [shape: f32[1], index: 1, kind: input, shape index: {}]   ;;  %s420_s2 = inlined_call_operand.vmem [shape: f32[1,8], index: 2, kind: input, shape index: {}]   ;;  %s421_s3 = inlined_call_operand.hbm [shape: f32[8,128], index: 3, kind: input, shape index: {}]   ;;  %s422_s4 = inlined_call_operand.hbm [shape: f32[8,128], index: 4, kind: input, shape index: {}]   ;;  %s423_s5 = inlined_call_operand.hbm [shape: f32[8,128], index: 5, kind: output, shape index: {}]  }
   0x1   :  { %13 = vsyncpa [#allocation10], 0 }
   0x2   :  { %14 = vsyncpa [#allocation8], 0  ;;  %s355_s18 = smov [#allocation6]   ;;  %s356_s20 = smov [#allocation9]  }
   0x3   :  { %s27_s19 = sshll.u32 %s355_s18, 4  ;;  %s37_s21 = sshll.u32 %s356_s20, 4  ;;  %s28_s19 = int_to_ptr.vmem [resolvable:$true] %s27_s19  ;;  %s38_s21 = int_to_ptr.vmem [resolvable:$true] %s37_s21 }
   0x4   :  { %s297_s22 = scalar_lea.vmem %s28_s19, 128  ;;  %p302_p1 = scmp.lt.s32.totalorder %s28_s19, %s28_s19 }
   0x5   :  { %p298_p0 = scmp.ne.s32.totalorder %s28_s19, %s297_s22  ;;  %p303_p2 = scmp.lt.s32.totalorder %s297_s22, %s297_s22 }
   0x7   :  { %p304_p3 = por %p303_p2, %p302_p1 }
   0x9   :  { %p305_p4 = pnand %p304_p3, %p298_p0 }
   0xb   :  { %308 = shalt.err (!%p305_p4)
}
   0xc   :  { %30 = dma.hbm_to_vmem [thread:$0]  %s421_s3, 128, %s28_s19, [#allocation7]  }
   0xd   :  { %s317_s25 = scalar_lea.vmem %s38_s21, 128  ;;  %p322_p6 = scmp.lt.s32.totalorder %s38_s21, %s38_s21 }
   0xe   :  { %p318_p5 = scmp.ne.s32.totalorder %s38_s21, %s317_s25  ;;  %p323_p7 = scmp.lt.s32.totalorder %s317_s25, %s317_s25 }
  0x10   :  { %p324_p8 = por %p323_p7, %p322_p6 }
  0x12   :  { %p325_p9 = pnand %p324_p8, %p318_p5 }
  0x14   :  { %328 = shalt.err (!%p325_p9)
}
  0x15   :  { %40 = dma.hbm_to_vmem [thread:$0]  %s422_s4, 128, %s38_s21, [#allocation10]  }
  0x16   :  { %349 = dma.done.wait [#allocation7], 128  }
  0x17   :  { %350 = vsyncadd [#allocation7], 4294967168 }
  0x18   :  { %351 = dma.done.wait [#allocation10], 128  }
  0x19   :  { %352 = vsyncadd [#allocation10], 4294967168  ;;  %vm52_vm0 = vcmask 7168   ;;  %v357_v0 = vmov inf   ;;  %v358_v1 = vmov 0.0   ;;  %vm359_vm1 = vmmov 0  }
  0x1a   :  { %53 = vst.msk [vmem:[#allocation2] sm:$0xff] %vm52_vm0, %v357_v0  ;;  %269 = vmatprep.subr.bf16.mxu0 %v358_v1  ;;  %271 = vmatprep.mubr.msk.bf16.mxu0 %vm359_vm1, %v358_v1  ;;  %v56_v2 = vld [vmem:[#allocation9] sm:$0xff]  ;;  %v55_v4 = vld [vmem:[#allocation6] sm:$0xff]  ;;  %v108_v6 = vlaneseq  ;;  %v120_v9 = vstv %s418_s0  ;;  %v262_v11 = vld [vmem:[%s420_s2] ss:$0 sm:$0xff]  ;;  %vm124_vm5 = vcmask 64512   ;;  %v242_v40 = vstv %s419_s1 }
  0x1b   :  { %275 = vmatprep.subr.mxu1 %v358_v1  ;;  %277 = vmatprep.mubr.msk.f32.mxu1 %vm359_vm1, %v358_v1  ;;  %v58_v3 = vpack.c.bf16 %v56_v2, %v56_v2  ;;  %v57_v5 = vpack.c.bf16 %v55_v4, %v55_v4  ;;  %v360_v19 = vmov 0   ;;  %s238_s30 = ssub.f32 1.0, %s419_s1  ;;  %s361_s8 = smov [#allocation11]  }
  0x1c   :  { %276 = vmatpush3.msra.mxu1 %v56_v2  ;;  %v109_v7 = vand.u32 127, %v108_v6  ;;  %v111_v8 = vshrl.u32 %v108_v6, 7  ;;  %287 = vset.pattern.permute.xlu1 %v360_v19  ;;  %s252_s9 = sshll.u32 %s361_s8, 4  ;;  %s253_s9 = int_to_ptr.vmem [resolvable:$true] %s252_s9 }
  0x1d   :  { %270 = vmatpush3.bf16.xpose.msra.mxu0 %v58_v3  ;;  %288 = vset.pattern.permute.xlu0 %v360_v19  ;;  %v239_v39 = vstv %s238_s30  ;;  %s329_s10 = scalar_lea.vmem %s253_s9, 128  ;;  %p334_p11 = scmp.lt.s32.totalorder %s253_s9, %s253_s9 }
  0x1e   :  { %vm119_vm2 = vcmp.eq.s32.totalorder %v111_v8, %v109_v7  ;;  %vm121_vm3 = vcmp.ge.s32.totalorder %v109_v7, %v120_v9  ;;  %v240_v42 = vmul.f32 %v239_v39, %v55_v4  ;;  %p330_p10 = scmp.ne.s32.totalorder %s253_s9, %s329_s10  ;;  %p335_p12 = scmp.lt.s32.totalorder %s329_s10, %s329_s10 }
  0x1f   :  { %vm122_vm4 = vmor %vm119_vm2, %vm121_vm3 }
  0x20   :  { %p336_p13 = por %p335_p12, %p334_p11 }
  0x21   :  { %v221_v20 = vld [vmem:[#allocation2] sm:$0xff] }
  0x22   :  { %p337_p0 = pnand %p336_p13, %p330_p10 }
  0x24   :  { %272 = vmatmul.mubr.bf16.vlgmr.msra.gmra.mxu0 %v57_v5 }
  0xe4   :  { %v93_v10 = vpop.f32.mrf.mxu0 }
  0xe5   :  { %v100_v12 = vmul.f32 2.0, %v93_v10 }
  0xe6   :  { %v273_v13 = vpop.f32.mrf.mxu0 }
  0xe7   :  { %v107_v14 = vsub.f32 %v262_v11, %v100_v12 }
  0xe8   :  { %v96_v15 = vpop.f32.mrf.mxu0 }
  0xe9   :  { %v123_v16 = vsel %vm122_vm4, 1e+30, %v107_v14 }
  0xea   :  { %v274_v17 = vpop.f32.mrf.mxu0  ;;  %v125_v18 = vsel %vm124_vm5, %v123_v16, inf }
  0xeb   :  { %126 = vmin.xlane.f32.xlu0 %v125_v18 }
 0x174   :  { %v127_v21 = vpop.xlane.xlu0 %126 }
 0x175   :  { %vm128_vm6 = vcmp.eq.f32.partialorder %v123_v16, %v127_v21  ;;  %vm222_vm7 = vcmp.lt.f32.partialorder %v127_v21, %v221_v20 }
 0x176   :  { %v129_v22 = vsel %vm128_vm6, %v109_v7, 8  ;;  %v223_v23 = vsel %vm222_vm7, %v127_v21, %v221_v20  ;;  %v227_v31 = vsel %vm222_vm7, 1, %v360_v19 }
 0x177   :  { %v130_v24 = vsel %vm124_vm5, %v129_v22, 2147483647  ;;  %225 = vst.msk [vmem:[#allocation2] sm:$0xff] %vm52_vm0, %v223_v23 }
 0x178   :  { %v132_v25 = vshra.s32 %v130_v24, 16  ;;  %v131_v27 = vand.u32 65535, %v130_v24 }
 0x17a   :  { %v134_v26 = vcvt.s32.f32 %v132_v25  ;;  %v133_v29 = vcvt.s32.f32 %v131_v27 }
 0x17c   :  { %135 = vmin.xlane.f32.xlu0 %v134_v26 }
 0x205   :  { %v136_v28 = vpop.xlane.xlu0 %135 }
 0x206   :  { %vm137_vm8 = vcmp.eq.f32.partialorder %v134_v26, %v136_v28  ;;  %v142_v32 = vcvt.f32.s32 %v136_v28 }
 0x207   :  { %v138_v30 = vsel %vm137_vm8, %v133_v29, inf }
 0x208   :  { %139 = vmin.xlane.f32.xlu1 %v138_v30  ;;  %v143_v34 = vshll.u32 %v142_v32, 16 }
 0x219   :  { %229 = vperm.xlu1 %287, %v227_v31  }
 0x291   :  { %v140_v33 = vpop.xlane.xlu1 %139 }
 0x292   :  { %v141_v35 = vcvt.f32.s32 %v140_v33 }
 0x294   :  { %v144_v36 = vadd.s32 %v143_v34, %v141_v35 }
 0x295   :  { %v230_v38 = vpop.permute.xlu1 %229 }
 0x296   :  { %vm145_vm9 = vcmp.eq.s32.totalorder %v109_v7, %v144_v36  ;;  %vm231_vm10 = vcmp.eq.s32.totalorder %v230_v38, 1 }
 0x297   :  { %v263_v37 = vsel %vm145_vm9, 1.0, %v358_v1 }
 0x298   :  { %278 = vmatmul.mubr.msk.f32.vlgmr.msra.gmra.mxu1 %vm124_vm5, %v263_v37 }
 0x358   :  { %v217_v41 = vpop.f32.mrf.mxu1 }
 0x359   :  { %v232_v43 = vsel %vm231_vm10, %v217_v41, 0.0 }
 0x35a   :  { %v243_v44 = vmul.f32 %v242_v40, %v232_v43  ;;  %v279_v45 = vpop.f32.mrf.mxu1 }
 0x35c   :  { %v244_v46 = vadd.f32 %v243_v44, %v240_v42 }
 0x35e   :  { %245 = vst [vmem:[#allocation11] sm:$0xff] %v244_v46 }
 0x35f   :  { %340 = shalt.err (!%p337_p0)
}
 0x360   :  { %255 = dma.vmem_to_hbm [thread:$0]  %s253_s9, 128, %s423_s5, [#allocation8]  }
 0x361   :  { %353 = dma.done.wait [#allocation8], 128  }
 0x362   :  { %354 = vsyncadd [#allocation8], 4294967168 }
 0x363   :  { %259 = vsyncpa [#allocation7], 1 }
 0x364   :  { %260 = vsyncpa [#allocation10], 1 }
 0x365   :  { %261 = vsyncpa [#allocation8], 1 }

</bundles_post_ra>
